<compile_context>
chip_gen: v7x
topology: tpu7x:2x2x1
jax: 0.10.0
libtpu: 0.0.40
codegen_flags: <defaults>
</compile_context>

<pallas_src>
import functools

import jax
import jax.numpy as jnp
from jax import lax
from jax.experimental import pallas as pl
from jax.experimental.pallas import tpu as pltpu

LANE = 128
_NEG = -1e30  # Python float literal -> not a captured traced constant


def _round_up(x, m):
    return ((x + m - 1) // m) * m


def gcn_layer_kernel(a_ref, x_ref, w_ref, b_ref, o_ref, *, act, n_valid):
    """One GCNConv layer on a (TM, Np) row block of A_hat.

    o = act( A_blk @ (X @ W) + b ).  bf16 MXU inputs, f32 accumulation,
    f32 elementwise epilogue (v5e has no bf16 VPU/EUP path).
    """
    # X @ W : X and W are fully resident in VMEM.  Recomputed per row tile so
    # the row-grid axis can stay "parallel" across TensorCores (no step-0 init).
    xw = jnp.dot(x_ref[...], w_ref[...], preferred_element_type=jnp.float32)
    # A_blk @ (X @ W) + b, accumulated in f32.
    h = jnp.dot(a_ref[...], xw.astype(jnp.bfloat16),
                preferred_element_type=jnp.float32)
    h = h + b_ref[...]

    if act == "relu":
        o_ref[...] = jnp.maximum(h, 0.0).astype(o_ref.dtype)
    else:  # "log_softmax" over classes; padded class columns masked out
        col = lax.broadcasted_iota(jnp.int32, h.shape, 1)
        valid = col < n_valid
        hm = jnp.where(valid, h, _NEG)
        m = jnp.max(hm, axis=1, keepdims=True)
        z = hm - m
        p = jnp.where(valid, jnp.exp(z), 0.0)
        lse = jnp.log(jnp.sum(p, axis=1, keepdims=True))
        o_ref[...] = (z - lse).astype(o_ref.dtype)


def _gcn_layer(a_p, x_p, w_p, b_p, *, tm, act, n_valid, out_dtype):
    np_, fp = x_p.shape
    hp = w_p.shape[1]
    grid = (np_ // tm,)

    kernel = functools.partial(gcn_layer_kernel, act=act, n_valid=int(n_valid))

    out_bytes = jnp.dtype(out_dtype).itemsize
    # VMEM budget: double-buffered A row blocks + output blocks, resident
    # X / W / bias, plus margin.  Clamp to 48 MiB (safe under v7x's 64 MiB).
    vmem_bytes = (2 * (tm * np_ * 2 + tm * hp * out_bytes)
                  + np_ * fp * 2 + fp * hp * 2 + hp * 4 + (4 << 20))
    vmem_limit = int(min(max(vmem_bytes, 16 << 20), 48 << 20))

    cost = pl.CostEstimate(
        flops=int(grid[0] * (2 * np_ * fp * hp + 2 * tm * np_ * hp)),
        transcendentals=int(np_ * hp if act == "log_softmax" else 0),
        bytes_accessed=int(a_p.size * 2 + x_p.size * 2 + w_p.size * 2
                           + b_p.size * 4 + np_ * hp * out_bytes),
    )

    return pl.pallas_call(
        kernel,
        out_shape=jax.ShapeDtypeStruct((np_, hp), out_dtype),
        grid_spec=pltpu.PrefetchScalarGridSpec(
            num_scalar_prefetch=0,
            grid=grid,
            in_specs=[
                pl.BlockSpec((tm, np_), lambda i: (i, 0)),   # A_hat row block
                pl.BlockSpec((np_, fp), lambda i: (0, 0)),   # X (resident)
                pl.BlockSpec((fp, hp), lambda i: (0, 0)),    # W (resident)
                pl.BlockSpec((1, hp), lambda i: (0, 0)),     # bias
            ],
            out_specs=pl.BlockSpec((tm, hp), lambda i: (i, 0)),
        ),
        compiler_params=pltpu.CompilerParams(
            dimension_semantics=("parallel",),
            vmem_limit_bytes=vmem_limit,
        ),
        cost_estimate=cost,
    )(a_p, x_p, w_p, b_p)


def _pad2(arr, rows, cols, dtype):
    r, c = arr.shape
    return jnp.pad(arr, ((0, rows - r), (0, cols - c))).astype(dtype)


def gcn_forward(a_hat, x, w1, b1, w2, b2):
    """Net.forward (eval mode): log_softmax(GCN2(relu(GCN1(x))), dim=1)."""
    n, f_in = x.shape
    hidden = w1.shape[1]
    n_classes = w2.shape[1]

    tm = min(512, _round_up(max(n, 1), LANE))   # row tile (multiple of 128)
    np_ = _round_up(n, tm)                      # padded node count
    fp = _round_up(f_in, LANE)
    hp = _round_up(hidden, LANE)
    cp = _round_up(n_classes, LANE)

    a_p = _pad2(a_hat, np_, np_, jnp.bfloat16)
    x_p = _pad2(x, np_, fp, jnp.bfloat16)
    w1_p = _pad2(w1, fp, hp, jnp.bfloat16)
    w2_p = _pad2(w2, hp, cp, jnp.bfloat16)
    b1_p = _pad2(b1.reshape(1, -1), 1, hp, jnp.float32)
    b2_p = _pad2(b2.reshape(1, -1), 1, cp, jnp.float32)

    # Layer 1: GCNConv(F -> H) + ReLU (bf16 output feeds layer 2's MXU).
    h1 = _gcn_layer(a_p, x_p, w1_p, b1_p, tm=tm, act="relu",
                    n_valid=hidden, out_dtype=jnp.bfloat16)
    # TODO(synk): F.dropout(training=True) would use pltpu.prng_*; eval-mode forward is identity.
    # Layer 2: GCNConv(H -> C) + log_softmax (padded classes masked in-kernel).
    out_p = _gcn_layer(a_p, h1, w2_p, b2_p, tm=tm, act="log_softmax",
                       n_valid=n_classes, out_dtype=jnp.float32)
    return out_p[:n, :n_classes]


def normalized_adjacency(edge_index, num_nodes):
    """A_hat = D^{-1/2} (A + I) D^{-1/2}, aggregation A[dst, src] = 1 (PyG GCNConv)."""
    src, dst = edge_index[0], edge_index[1]
    a = jnp.zeros((num_nodes, num_nodes), jnp.float32)
    a = a.at[dst, src].set(1.0)
    a = a + jnp.eye(num_nodes, dtype=jnp.float32)
    deg = a.sum(axis=1)
    d_inv_sqrt = jnp.where(deg > 0, 1.0 / jnp.sqrt(deg), 0.0)
    return d_inv_sqrt[:, None] * a * d_inv_sqrt[None, :]


def glorot(key, shape):
    fan_in, fan_out = shape
    limit = jnp.sqrt(6.0 / (fan_in + fan_out))
    return jax.random.uniform(key, shape, jnp.float32, -limit, limit)


def gcn_reference(a_hat, x, w1, b1, w2, b2):
    """Pure-JAX f32 reference of Net.forward (eval mode)."""
    h1 = jnp.maximum(a_hat @ (x @ w1) + b1, 0.0)
    h2 = a_hat @ (h1 @ w2) + b2
    return jax.nn.log_softmax(h2, axis=1)


if __name__ == "__main__":
    key = jax.random.PRNGKey(0)
    k_x, k_w1, k_w2 = jax.random.split(key, 3)

    # Small synthetic "dataset": N nodes, num_node_features=8, num_classes=4
    N, F_IN, HIDDEN, N_CLASSES = 16, 8, 16, 4

    # Node features
    x = jax.random.normal(k_x, (N, F_IN), jnp.float32)

    # Undirected ring graph as edge_index (2, E)
    fwd = jnp.arange(N)
    nxt = (fwd + 1) % N
    edge_index = jnp.stack(
        [jnp.concatenate([fwd, nxt]), jnp.concatenate([nxt, fwd])], axis=0
    ).astype(jnp.int32)

    a_hat = normalized_adjacency(edge_index, N)

    # Deterministic parameter init (Glorot weights, zero biases) — synthetic, no checkpoint
    w1 = glorot(k_w1, (F_IN, HIDDEN))
    b1 = jnp.zeros((1, HIDDEN), jnp.float32)
    w2 = glorot(k_w2, (HIDDEN, N_CLASSES))
    b2 = jnp.zeros((1, N_CLASSES), jnp.float32)

    out = gcn_forward(a_hat, x, w1, b1, w2, b2)
    out = jax.block_until_ready(out)

    # Sanity 1: shape + log_softmax rows sum to ~1 in prob space
    probs_sum = jnp.sum(jnp.exp(out), axis=1)
    assert out.shape == (N, N_CLASSES)
    assert bool(jnp.all(jnp.abs(probs_sum - 1.0) < 1e-4))

    # Sanity 2: matches pure-JAX f32 reference (loose tol: bf16 matmul inputs)
    ref = gcn_reference(a_hat, x, w1, b1, w2, b2)
    assert bool(jnp.all(jnp.abs(out - ref) < 5e-2))

    print("KERNEL_OK")
</pallas_src>

<mosaic_0001>
module attributes {stable_mosaic.version = 11 : i64} {
  func.func @gcn_layer_kernel(%arg0: i32, %arg1: memref<128x128xbf16, #tpu.memory_space<vmem>>, %arg2: memref<128x128xbf16, #tpu.memory_space<vmem>>, %arg3: memref<128x128xbf16, #tpu.memory_space<vmem>>, %arg4: memref<1x128xf32, #tpu.memory_space<vmem>>, %arg5: memref<128x128xbf16, #tpu.memory_space<vmem>>) attributes {dimension_semantics = [#tpu.dimension_semantics<parallel>], iteration_bounds = array<i64: 1>, scalar_prefetch = 0 : i64, scratch_operands = 0 : i64, tpu.core_type = #tpu.core_type<tc>, window_params = [{transform_indices = @transform_0, window_bounds = array<i64: 128, 128>}, {pipeline_mode = #tpu.pipeline_mode<synchronous>, transform_indices = @transform_1, window_bounds = array<i64: 128, 128>}, {pipeline_mode = #tpu.pipeline_mode<synchronous>, transform_indices = @transform_2, window_bounds = array<i64: 128, 128>}, {pipeline_mode = #tpu.pipeline_mode<synchronous>, transform_indices = @transform_3, window_bounds = array<i64: 1, 128>}, {transform_indices = @transform_4, window_bounds = array<i64: 128, 128>}]} {
    %c0 = arith.constant 0 : index
    %c0_0 = arith.constant 0 : index
    %0 = vector.load %arg2[%c0, %c0_0] : memref<128x128xbf16, #tpu.memory_space<vmem>>, vector<128x128xbf16>
    %c0_1 = arith.constant 0 : index
    %c0_2 = arith.constant 0 : index
    %1 = vector.load %arg3[%c0_1, %c0_2] : memref<128x128xbf16, #tpu.memory_space<vmem>>, vector<128x128xbf16>
    %cst = arith.constant dense<0.000000e+00> : vector<128x128xf32>
    %2 = tpu.matmul %0, %1, %cst {dimension_numbers = #tpu.dot_dimension_numbers<[1], [0], [0], [1], [0, 0, 1, 1], [], []>} : vector<128x128xbf16>, vector<128x128xbf16>, vector<128x128xf32> -> vector<128x128xf32>
    %c0_3 = arith.constant 0 : index
    %c0_4 = arith.constant 0 : index
    %3 = vector.load %arg1[%c0_3, %c0_4] : memref<128x128xbf16, #tpu.memory_space<vmem>>, vector<128x128xbf16>
    %4 = arith.truncf %2 : vector<128x128xf32> to vector<128x128xbf16>
    %cst_5 = arith.constant dense<0.000000e+00> : vector<128x128xf32>
    %5 = tpu.matmul %3, %4, %cst_5 {dimension_numbers = #tpu.dot_dimension_numbers<[1], [0], [0], [1], [0, 0, 1, 1], [], []>} : vector<128x128xbf16>, vector<128x128xbf16>, vector<128x128xf32> -> vector<128x128xf32>
    %c0_6 = arith.constant 0 : index
    %c0_7 = arith.constant 0 : index
    %6 = vector.load %arg4[%c0_6, %c0_7] : memref<1x128xf32, #tpu.memory_space<vmem>>, vector<1x128xf32>
    %7 = vector.broadcast %6 : vector<1x128xf32> to vector<128x128xf32>
    %8 = arith.addf %5, %7 : vector<128x128xf32>
    %cst_8 = arith.constant 0.000000e+00 : f32
    %9 = vector.broadcast %cst_8 : f32 to vector<128x128xf32>
    %10 = arith.maximumf %8, %9 : vector<128x128xf32>
    %11 = arith.truncf %10 : vector<128x128xf32> to vector<128x128xbf16>
    %c0_9 = arith.constant 0 : index
    %c0_10 = arith.constant 0 : index
    %12 = vector.load %arg5[%c0_9, %c0_10] : memref<128x128xbf16, #tpu.memory_space<vmem>>, vector<128x128xbf16>
    tpu.vector_store %arg5[%c0_9, %c0_10], %11 {strides = array<i32>} : memref<128x128xbf16, #tpu.memory_space<vmem>>, vector<128x128xbf16>,
    return
  }
  func.func @transform_0(%arg0: i32) -> (i32, i32) {
    %c0_i32 = arith.constant 0 : i32
    %c0_i32_0 = arith.constant 0 : i32
    return %arg0, %c0_i32 : i32, i32
  }
  func.func @transform_1(%arg0: i32) -> (i32, i32) {
    %c0_i32 = arith.constant 0 : i32
    %c0_i32_0 = arith.constant 0 : i32
    %c0_i32_1 = arith.constant 0 : i32
    return %c0_i32, %c0_i32_0 : i32, i32
  }
  func.func @transform_2(%arg0: i32) -> (i32, i32) {
    %c0_i32 = arith.constant 0 : i32
    %c0_i32_0 = arith.constant 0 : i32
    %c0_i32_1 = arith.constant 0 : i32
    return %c0_i32, %c0_i32_0 : i32, i32
  }
  func.func @transform_3(%arg0: i32) -> (i32, i32) {
    %c0_i32 = arith.constant 0 : i32
    %c0_i32_0 = arith.constant 0 : i32
    %c0_i32_1 = arith.constant 0 : i32
    return %c0_i32, %c0_i32_0 : i32, i32
  }
  func.func @transform_4(%arg0: i32) -> (i32, i32) {
    %c0_i32 = arith.constant 0 : i32
    %c0_i32_0 = arith.constant 0 : i32
    return %arg0, %c0_i32 : i32, i32
  }
}

</mosaic_0001>

<bundles_post_ra>
// kernel: tpu_custom_call.1
= control target key start
LH: loop header
LB: loop body
LE: loop exit
PB: predicated region body
PF: predicated region fallthrough
CT: control target
= control target key end

     0   :  { %9 = vsyncpa [#allocation3], 0  ;;  %s1000_s0 = inlined_call_operand.hbm [shape: bf16[128,128], index: 0, kind: input, shape index: {}]   ;;  %s1001_s1 = inlined_call_operand.hbm [shape: bf16[128,128], index: 1, kind: input, shape index: {}]   ;;  %s1002_s2 = inlined_call_operand.hbm [shape: bf16[128,128], index: 2, kind: input, shape index: {}]   ;;  %s1003_s3 = inlined_call_operand.vmem [shape: f32[1,128], index: 3, kind: input, shape index: {}]   ;;  %s1004_s4 = inlined_call_operand.hbm [shape: bf16[128,128], index: 4, kind: output, shape index: {}]  }
   0x1   :  { %10 = vsyncpa [#allocation6], 0 }
   0x2   :  { %11 = vsyncpa [#allocation4], 0  ;;  %s899_s15 = smov [#allocation5]   ;;  %s900_s17 = smov [#allocation2]  }
   0x3   :  { %s29_s16 = sshll.u32 %s899_s15, 4  ;;  %s17_s18 = sshll.u32 %s900_s17, 4  ;;  %s30_s16 = int_to_ptr.vmem [resolvable:$true] %s29_s16  ;;  %s930_s18 = int_to_ptr.vmem [resolvable:$true] %s17_s18 }
   0x4   :  { %s805_s21 = scalar_lea.hbm %s1001_s1, 1024 }
   0x5   :  { %p806_p0 = scmp.ne.s32.totalorder %s1001_s1, %s805_s21  ;;  %p809_p1 = scmp.lt.u32.totalorder %s805_s21, %s1001_s1 }
   0x7   :  { %p811_p2 = pnand %p809_p1, %p806_p0 }
   0x9   :  { %814 = shalt.err (!%p811_p2)
}
   0xa   :  { %s815_s26 = scalar_lea.vmem %s30_s16, 1024  ;;  %p820_p4 = scmp.lt.s32.totalorder %s30_s16, %s30_s16 }
   0xb   :  { %p816_p3 = scmp.ne.s32.totalorder %s30_s16, %s815_s26  ;;  %p821_p5 = scmp.lt.s32.totalorder %s815_s26, %s815_s26 }
   0xd   :  { %p822_p6 = por %p821_p5, %p820_p4 }
   0xf   :  { %p823_p7 = pnand %p822_p6, %p816_p3 }
  0x11   :  { %826 = shalt.err (!%p823_p7)
}
  0x12   :  { %s901_s27 = smov 64   ;;  %s902_s28 = smov 4  }
  0x13   :  { %35 = dma.hbm_to_vmem [thread:$0]  %s1001_s1, 1024, %s30_s16, [#allocation6], %s901_s27, %s901_s27, %s902_s28  }
  0x14   :  { %s827_s7 = scalar_lea.hbm %s1000_s0, 1024 }
  0x15   :  { %p828_p8 = scmp.ne.s32.totalorder %s1000_s0, %s827_s7  ;;  %p831_p9 = scmp.lt.u32.totalorder %s827_s7, %s1000_s0 }
  0x17   :  { %p833_p10 = pnand %p831_p9, %p828_p8 }
  0x19   :  { %836 = shalt.err (!%p833_p10)
}
  0x1a   :  { %s837_s12 = scalar_lea.vmem %s930_s18, 1024  ;;  %p842_p12 = scmp.lt.s32.totalorder %s930_s18, %s930_s18 }
  0x1b   :  { %p838_p11 = scmp.ne.s32.totalorder %s930_s18, %s837_s12  ;;  %p843_p13 = scmp.lt.s32.totalorder %s837_s12, %s837_s12 }
  0x1d   :  { %p844_p0 = por %p843_p13, %p842_p12 }
  0x1f   :  { %p845_p1 = pnand %p844_p0, %p838_p11 }
  0x21   :  { %848 = shalt.err (!%p845_p1)
}
  0x22   :  { %23 = dma.hbm_to_vmem [thread:$0]  %s1000_s0, 1024, %s930_s18, [#allocation3], %s901_s27, %s901_s27, %s902_s28  }
  0x23   :  { %s903_s14 = smov [#allocation7]   ;;  %s849_s19 = scalar_lea.hbm %s1002_s2, 1024 }
  0x24   :  { %s41_s15 = sshll.u32 %s903_s14, 4  ;;  %p850_p2 = scmp.ne.s32.totalorder %s1002_s2, %s849_s19  ;;  %s42_s15 = int_to_ptr.vmem [resolvable:$true] %s41_s15 }
  0x25   :  { %p853_p3 = scmp.lt.u32.totalorder %s849_s19, %s1002_s2 }
  0x27   :  { %p855_p4 = pnand %p853_p3, %p850_p2 }
  0x29   :  { %858 = shalt.err (!%p855_p4)
}
  0x2a   :  { %s859_s24 = scalar_lea.vmem %s42_s15, 1024  ;;  %p864_p6 = scmp.lt.s32.totalorder %s42_s15, %s42_s15 }
  0x2b   :  { %p860_p5 = scmp.ne.s32.totalorder %s42_s15, %s859_s24  ;;  %p865_p7 = scmp.lt.s32.totalorder %s859_s24, %s859_s24 }
  0x2d   :  { %p866_p8 = por %p865_p7, %p864_p6 }
  0x2f   :  { %p867_p9 = pnand %p866_p8, %p860_p5 }
  0x31   :  { %870 = shalt.err (!%p867_p9)
}
  0x32   :  { %47 = dma.hbm_to_vmem [thread:$0]  %s1002_s2, 1024, %s42_s15, [#allocation6], %s901_s27, %s901_s27, %s902_s28  }
  0x33   :  { %893 = dma.done.wait [#allocation3], 1024  }
  0x34   :  { %894 = vsyncadd [#allocation3], 4294966272 }
  0x35   :  { %895 = dma.done.wait [#allocation6], 2048  }
  0x36   :  { %896 = vsyncadd [#allocation6], 4294965248  ;;  %v781_v0 = vld [vmem:[#allocation7] sm:$0xff]   ;;  %v782_v1 = vld [vmem:[#allocation7 + $0x8] sm:$0xff]  }
  0x37   :  { %711 = vmatprep.subr.bf16.mxu0 %v781_v0  ;;  %v783_v2 = vld [vmem:[#allocation7 + $0x10] sm:$0xff]   ;;  %v784_v3 = vld [vmem:[#allocation7 + $0x18] sm:$0xff]   ;;  %v789_v4 = vld [vmem:[#allocation5] sm:$0xff]  }
  0x38   :  { %712 = vmatpush3.bf16.msra.mxu0 %v781_v0  ;;  %727 = vmatprep.mubr.bf16.mxu0 %v789_v4  ;;  %v785_v5 = vld [vmem:[#allocation7 + $0x20] sm:$0xff]   ;;  %v786_v6 = vld [vmem:[#allocation7 + $0x28] sm:$0xff]   ;;  %v787_v7 = vld [vmem:[#allocation7 + $0x30] sm:$0xff]  }
  0x39   :  { %713 = vmatprep.subr.bf16.mxu0 %v782_v1  ;;  %v788_v8 = vld [vmem:[#allocation7 + $0x38] sm:$0xff]   ;;  %v790_v9 = vld [vmem:[#allocation5 + $0x8] sm:$0xff]   ;;  %v791_v10 = vld [vmem:[#allocation5 + $0x10] sm:$0xff]  }
  0x3a   :  { %v792_v11 = vld [vmem:[#allocation5 + $0x18] sm:$0xff]   ;;  %v793_v12 = vld [vmem:[#allocation5 + $0x20] sm:$0xff]   ;;  %v794_v13 = vld [vmem:[#allocation5 + $0x28] sm:$0xff]  }
  0x3b   :  { %v795_v14 = vld [vmem:[#allocation5 + $0x30] sm:$0xff]   ;;  %v796_v15 = vld [vmem:[#allocation5 + $0x38] sm:$0xff]   ;;  %v797_v16 = vld [vmem:[#allocation2] sm:$0xff]  }
  0x3c   :  { %714 = vmatpush3.bf16.msra.mxu0 %v782_v1  ;;  %759 = vmatprep.mubr.bf16.mxu1 %v797_v16  ;;  %v798_v41 = vld [vmem:[#allocation2 + $0x8] sm:$0xff]   ;;  %v799_v42 = vld [vmem:[#allocation2 + $0x10] sm:$0xff]   ;;  %v800_v43 = vld [vmem:[#allocation2 + $0x18] sm:$0xff]  }
  0x3d   :  { %715 = vmatprep.subr.bf16.mxu0 %v783_v2  ;;  %v801_v44 = vld [vmem:[#allocation2 + $0x20] sm:$0xff]   ;;  %v802_v45 = vld [vmem:[#allocation2 + $0x28] sm:$0xff]   ;;  %v803_v46 = vld [vmem:[#allocation2 + $0x30] sm:$0xff]  }
  0x3e   :  { %v804_v47 = vld [vmem:[#allocation2 + $0x38] sm:$0xff]   ;;  %v591_v48 = vld [vmem:[%s1003_s3] ss:$0 sm:$0xff]  ;;  %s904_s3 = smov [#allocation8]  }
  0x3f   :  { %s562_s26 = sshll.u32 %s904_s3, 4  ;;  %s563_s26 = int_to_ptr.vmem [resolvable:$true] %s562_s26 }
  0x40   :  { %716 = vmatpush3.bf16.msra.mxu0 %v783_v2  ;;  %s871_s29 = scalar_lea.vmem %s563_s26, 1024  ;;  %p876_p11 = scmp.lt.s32.totalorder %s563_s26, %s563_s26 }
  0x41   :  { %717 = vmatprep.subr.bf16.mxu0 %v784_v3  ;;  %p872_p10 = scmp.ne.s32.totalorder %s563_s26, %s871_s29  ;;  %p877_p12 = scmp.lt.s32.totalorder %s871_s29, %s871_s29 }
  0x43   :  { %p878_p13 = por %p877_p12, %p876_p11 }
  0x44   :  { %718 = vmatpush3.bf16.msra.mxu0 %v784_v3 }
  0x45   :  { %719 = vmatprep.subr.bf16.mxu0 %v785_v5  ;;  %p879_p0 = pnand %p878_p13, %p872_p10 }
  0x48   :  { %720 = vmatpush3.bf16.msra.mxu0 %v785_v5 }
  0x49   :  { %721 = vmatprep.subr.bf16.mxu0 %v786_v6 }
  0x4c   :  { %722 = vmatpush3.bf16.msra.mxu0 %v786_v6 }
  0x4d   :  { %723 = vmatprep.subr.bf16.mxu0 %v787_v7 }
  0x50   :  { %724 = vmatpush3.bf16.msra.mxu0 %v787_v7 }
  0x51   :  { %725 = vmatprep.subr.bf16.mxu0 %v788_v8 }
  0x54   :  { %726 = vmatpush3.bf16.msra.mxu0 %v788_v8 }
  0x57   :  { %728 = vmatmul.mubr.bf16.vlgmr.msra.gmra.mrb[0].mxu0 %v790_v9 }
  0x58   :  { %731 = vmatprep.mubr.bf16.mxu0 %v791_v10 }
  0x5f   :  { %732 = vmatmul.mubr.bf16.gmra.mrb[4].mxu0 %v792_v11 }
  0x60   :  { %735 = vmatprep.mubr.bf16.mxu0 %v793_v12 }
  0x67   :  { %736 = vmatmul.mubr.bf16.gmra.mrb[8].mxu0 %v794_v13 }
  0x68   :  { %739 = vmatprep.mubr.bf16.mxu0 %v795_v14 }
  0x6f   :  { %740 = vmatmul.mubr.bf16.gmra.mrb[12].mxu0 %v796_v15 }
 0x12a   :  { %v729_v17 = vpop.f32.mrb[0].mxu0 }
 0x12b   :  { %v222_v18 = vpop.f32.mrb[1].mxu0 }
 0x12c   :  { %v730_v19 = vpop.f32.mrb[2].mxu0 }
 0x12d   :  { %v302_v20 = vpack.c.bf16 %v730_v19, %v729_v17  ;;  %v225_v21 = vpop.f32.mrb[3].mxu0 }
 0x12e   :  { %v301_v22 = vpack.c.bf16 %v225_v21, %v222_v18 }
 0x130   :  { %743 = vmatprep.subr.bf16.mxu1 %v301_v22 }
 0x131   :  { %744 = vmatpush3.bf16.msra.mxu1 %v301_v22 }
 0x132   :  { %v733_v23 = vpop.f32.mrb[4].mxu0  ;;  %745 = vmatprep.subr.bf16.mxu1 %v302_v20 }
 0x133   :  { %v238_v24 = vpop.f32.mrb[5].mxu0 }
 0x134   :  { %v734_v25 = vpop.f32.mrb[6].mxu0 }
 0x135   :  { %v304_v26 = vpack.c.bf16 %v734_v25, %v733_v23  ;;  %v241_v27 = vpop.f32.mrb[7].mxu0  ;;  %746 = vmatpush3.bf16.msra.mxu1 %v302_v20 }
 0x136   :  { %v303_v28 = vpack.c.bf16 %v241_v27, %v238_v24 }
 0x138   :  { %747 = vmatprep.subr.bf16.mxu1 %v303_v28 }
 0x139   :  { %748 = vmatpush3.bf16.msra.mxu1 %v303_v28 }
 0x13a   :  { %v737_v29 = vpop.f32.mrb[8].mxu0  ;;  %749 = vmatprep.subr.bf16.mxu1 %v304_v26 }
 0x13b   :  { %v254_v30 = vpop.f32.mrb[9].mxu0 }
 0x13c   :  { %v738_v31 = vpop.f32.mrb[10].mxu0 }
 0x13d   :  { %v306_v32 = vpack.c.bf16 %v738_v31, %v737_v29  ;;  %v257_v33 = vpop.f32.mrb[11].mxu0  ;;  %750 = vmatpush3.bf16.msra.mxu1 %v304_v26 }
 0x13e   :  { %v305_v34 = vpack.c.bf16 %v257_v33, %v254_v30 }
 0x140   :  { %751 = vmatprep.subr.bf16.mxu1 %v305_v34 }
 0x141   :  { %752 = vmatpush3.bf16.msra.mxu1 %v305_v34 }
 0x142   :  { %v741_v35 = vpop.f32.mrb[12].mxu0  ;;  %753 = vmatprep.subr.bf16.mxu1 %v306_v32 }
 0x143   :  { %v270_v36 = vpop.f32.mrb[13].mxu0 }
 0x144   :  { %v742_v37 = vpop.f32.mrb[14].mxu0 }
 0x145   :  { %v308_v38 = vpack.c.bf16 %v742_v37, %v741_v35  ;;  %v273_v39 = vpop.f32.mrb[15].mxu0  ;;  %754 = vmatpush3.bf16.msra.mxu1 %v306_v32 }
 0x146   :  { %v307_v40 = vpack.c.bf16 %v273_v39, %v270_v36 }
 0x148   :  { %755 = vmatprep.subr.bf16.mxu1 %v307_v40 }
 0x149   :  { %756 = vmatpush3.bf16.msra.mxu1 %v307_v40 }
 0x14a   :  { %757 = vmatprep.subr.bf16.mxu1 %v308_v38 }
 0x14d   :  { %758 = vmatpush3.bf16.msra.mxu1 %v308_v38 }
 0x150   :  { %760 = vmatmul.mubr.bf16.vlgmr.msra.gmra.mrb[0].mxu1 %v798_v41 }
 0x151   :  { %763 = vmatprep.mubr.bf16.mxu1 %v799_v42 }
 0x158   :  { %764 = vmatmul.mubr.bf16.gmra.mrb[4].mxu1 %v800_v43 }
 0x159   :  { %767 = vmatprep.mubr.bf16.mxu1 %v801_v44 }
 0x160   :  { %768 = vmatmul.mubr.bf16.gmra.mrb[8].mxu1 %v802_v45 }
 0x161   :  { %771 = vmatprep.mubr.bf16.mxu1 %v803_v46 }
 0x168   :  { %772 = vmatmul.mubr.bf16.gmra.mrb[12].mxu1 %v804_v47 }
 0x223   :  { %v761_v49 = vpop.f32.mrb[0].mxu1 }
 0x224   :  { %v407_v50 = vadd.f32 %v761_v49, %v591_v48  ;;  %v398_v51 = vpop.f32.mrb[1].mxu1 }
 0x225   :  { %v399_v52 = vadd.f32 %v591_v48, %v398_v51  ;;  %v762_v53 = vpop.f32.mrb[2].mxu1 }
 0x226   :  { %v410_v54 = vadd.f32 %v762_v53, %v591_v48  ;;  %v401_v55 = vpop.f32.mrb[3].mxu1  ;;  %v463_v57 = vmax.f32 %v407_v50, 0.0 }
 0x227   :  { %v402_v56 = vadd.f32 %v591_v48, %v401_v55  ;;  %v461_v59 = vmax.f32 %v399_v52, 0.0 }
 0x228   :  { %v464_v58 = vmax.f32 %v410_v54, 0.0 }
 0x229   :  { %v462_v60 = vmax.f32 %v402_v56, 0.0 }
 0x22a   :  { %v640_v61 = vpack.c.bf16 %v464_v58, %v463_v57 }
 0x22b   :  { %v635_v62 = vpack.c.bf16 %v462_v60, %v461_v59  ;;  %v765_v63 = vpop.f32.mrb[4].mxu1 }
 0x22c   :  { %672 = vst [vmem:[#allocation8 + $0x8] sm:$0xff] %v640_v61   ;;  %v423_v0 = vadd.f32 %v765_v63, %v591_v48  ;;  %v414_v1 = vpop.f32.mrb[5].mxu1 }
 0x22d   :  { %636 = vst [vmem:[#allocation8] sm:$0xff] %v635_v62   ;;  %v415_v2 = vadd.f32 %v591_v48, %v414_v1  ;;  %v766_v3 = vpop.f32.mrb[6].mxu1 }
 0x22e   :  { %v426_v4 = vadd.f32 %v766_v3, %v591_v48  ;;  %v417_v5 = vpop.f32.mrb[7].mxu1  ;;  %v467_v7 = vmax.f32 %v423_v0, 0.0 }
 0x22f   :  { %v418_v6 = vadd.f32 %v591_v48, %v417_v5  ;;  %v465_v9 = vmax.f32 %v415_v2, 0.0 }
 0x230   :  { %v468_v8 = vmax.f32 %v426_v4, 0.0 }
 0x231   :  { %v466_v10 = vmax.f32 %v418_v6, 0.0 }
 0x232   :  { %v650_v11 = vpack.c.bf16 %v468_v8, %v467_v7 }
 0x233   :  { %v645_v12 = vpack.c.bf16 %v466_v10, %v465_v9  ;;  %v769_v13 = vpop.f32.mrb[8].mxu1 }
 0x234   :  { %674 = vst [vmem:[#allocation8 + $0x18] sm:$0xff] %v650_v11   ;;  %v439_v14 = vadd.f32 %v769_v13, %v591_v48  ;;  %v430_v15 = vpop.f32.mrb[9].mxu1 }
 0x235   :  { %673 = vst [vmem:[#allocation8 + $0x10] sm:$0xff] %v645_v12   ;;  %v431_v16 = vadd.f32 %v591_v48, %v430_v15  ;;  %v770_v17 = vpop.f32.mrb[10].mxu1 }
 0x236   :  { %v442_v18 = vadd.f32 %v770_v17, %v591_v48  ;;  %v433_v19 = vpop.f32.mrb[11].mxu1  ;;  %v471_v21 = vmax.f32 %v439_v14, 0.0 }
 0x237   :  { %v434_v20 = vadd.f32 %v591_v48, %v433_v19  ;;  %v469_v23 = vmax.f32 %v431_v16, 0.0 }
 0x238   :  { %v472_v22 = vmax.f32 %v442_v18, 0.0 }
 0x239   :  { %v470_v24 = vmax.f32 %v434_v20, 0.0 }
 0x23a   :  { %v660_v25 = vpack.c.bf16 %v472_v22, %v471_v21 }
 0x23b   :  { %v655_v26 = vpack.c.bf16 %v470_v24, %v469_v23  ;;  %v773_v27 = vpop.f32.mrb[12].mxu1 }
 0x23c   :  { %676 = vst [vmem:[#allocation8 + $0x28] sm:$0xff] %v660_v25   ;;  %v455_v28 = vadd.f32 %v773_v27, %v591_v48  ;;  %v446_v29 = vpop.f32.mrb[13].mxu1 }
 0x23d   :  { %675 = vst [vmem:[#allocation8 + $0x20] sm:$0xff] %v655_v26   ;;  %v447_v30 = vadd.f32 %v591_v48, %v446_v29  ;;  %v774_v31 = vpop.f32.mrb[14].mxu1 }
 0x23e   :  { %v458_v32 = vadd.f32 %v774_v31, %v591_v48  ;;  %v449_v33 = vpop.f32.mrb[15].mxu1  ;;  %v475_v35 = vmax.f32 %v455_v28, 0.0 }
 0x23f   :  { %v450_v34 = vadd.f32 %v591_v48, %v449_v33  ;;  %v473_v37 = vmax.f32 %v447_v30, 0.0 }
 0x240   :  { %v476_v36 = vmax.f32 %v458_v32, 0.0 }
 0x241   :  { %v474_v38 = vmax.f32 %v450_v34, 0.0 }
 0x242   :  { %v670_v39 = vpack.c.bf16 %v476_v36, %v475_v35 }
 0x243   :  { %v665_v40 = vpack.c.bf16 %v474_v38, %v473_v37 }
 0x244   :  { %678 = vst [vmem:[#allocation8 + $0x38] sm:$0xff] %v670_v39  }
 0x245   :  { %677 = vst [vmem:[#allocation8 + $0x30] sm:$0xff] %v665_v40  }
 0x246   :  { %882 = shalt.err (!%p879_p0)
}
 0x247   :  { %s883_s6 = scalar_lea.hbm %s1004_s4, 1024 }
 0x248   :  { %p884_p1 = scmp.ne.s32.totalorder %s1004_s4, %s883_s6  ;;  %p887_p2 = scmp.lt.u32.totalorder %s883_s6, %s1004_s4 }
 0x24a   :  { %p889_p3 = pnand %p887_p2, %p884_p1 }
 0x24c   :  { %892 = shalt.err (!%p889_p3)
}
 0x24d   :  { %568 = dma.vmem_to_hbm [thread:$0]  %s563_s26, 1024, %s1004_s4, [#allocation4], %s901_s27, %s901_s27, %s902_s28  }
 0x24e   :  { %897 = dma.done.wait [#allocation4], 1024  }
 0x24f   :  { %898 = vsyncadd [#allocation4], 4294966272 }
 0x250   :  { %572 = vsyncpa [#allocation3], 1 }
 0x251   :  { %573 = vsyncpa [#allocation6], 1 }
 0x252   :  { %574 = vsyncpa [#allocation4], 1 }

</bundles_post_ra>
